<compile_context>
chip_gen: v6e
topology: v6e:2x2x1
jax: 0.10.0
libtpu: 0.0.40
codegen_flags: <defaults>
</compile_context>

<pallas_src>
import functools

import jax
import jax.numpy as jnp
from jax.experimental import pallas as pl
from jax.experimental.pallas import tpu as pltpu

_EPS = 1e-5  # nn.BatchNorm2d default eps


def _round_up(v, m):
    return (v + m - 1) // m * m


def _exact_mod(p, d):
    """p mod d for int32 vectors, d a positive Python int.

    Avoids vector integer division (not universally lowered by Mosaic): the
    quotient is approximated in f32 and the remainder corrected by one step in
    either direction, which is exact whenever the f32 quotient is within +-1 of
    the true quotient (always true here: quotients are < batch or < Hp).
    """
    q = jnp.floor(p.astype(jnp.float32) * (1.0 / float(d))).astype(jnp.int32)
    r = p - q * d
    r = jnp.where(r < 0, r + d, r)
    r = jnp.where(r >= d, r - d, r)
    return r


def _conv_tile(xbuf, w_ref, *, offsets, tm, fuse_taps):
    """Complex conv of one lane tile -> (2*Cout, TM) f32, from the stitched halo buffer."""
    if fuse_taps:
        # Wide channels: one fused MXU matmul (2*Cout, Kc) @ (Kc, TM).
        taps = [xbuf[:, off:off + tm] for off in offsets]
        xs = jnp.concatenate(taps, axis=0)
        return jnp.dot(w_ref[...], xs, preferred_element_type=jnp.float32)
    # Narrow channels: unrolled per-tap accumulation; skips the (Kc, TM) im2col
    # concat (VMEM store+load traffic) -- the MXU is idle at these sizes anyway.
    acc = None
    for t, off in enumerate(offsets):
        d = jnp.dot(w_ref[t], xbuf[:, off:off + tm],
                    preferred_element_type=jnp.float32)
        acc = d if acc is None else acc + d
    return acc


def _stats_kernel(x_ref, xh_ref, w_ref, stats_ref, xbuf, *,
                  offsets, fuse_taps, hp_wp, wp, ho_wp, wo, mp):
    """Pass 1: fused complex conv + masked per-tile BN partial stats (stats only to HBM).

    x_ref    : (2*Cin, TM)   current tile of the flattened padded input
    xh_ref   : (2*Cin, HB)   right halo (next HB lanes after this tile)
    w_ref    : complex-conv weights (fused (2*Cout, Kc) or per-tap (kh*kw, 2*Cout, 2*Cin))
    stats_ref: (1, 2*Cout, 2) per-tile [sum, sum_sq] per channel
    xbuf     : VMEM scratch (2*Cin, TM + HB)
    """
    tm = x_ref.shape[1]
    hb = xh_ref.shape[1]

    # Stitch tile + halo so the kh*kw shifted windows are plain static-offset slices.
    xbuf[:, :tm] = x_ref[...]
    xbuf[:, tm:tm + hb] = xh_ref[...]

    y = _conv_tile(xbuf, w_ref, offsets=offsets, tm=tm, fuse_taps=fuse_taps)

    # In-kernel validity mask over the flat padded grid (pad rows/cols + tail).
    base = pl.program_id(0) * tm
    p = base + jax.lax.broadcasted_iota(jnp.int32, (1, tm), 1)
    rem_img = _exact_mod(p, hp_wp)          # position within its image's padded grid
    col = _exact_mod(rem_img, wp)           # == p mod Wp
    m = ((p < mp) & (rem_img < ho_wp) & (col < wo)).astype(jnp.float32)

    ym = y * m
    s = jnp.sum(ym, axis=1, keepdims=True)              # (2*Cout, 1)
    sq = jnp.sum(ym * y, axis=1, keepdims=True)         # (2*Cout, 1)
    stats_ref[...] = jnp.concatenate([s, sq], axis=1)[None]   # (1, 2*Cout, 2)


def _conv_bn_prelu_kernel(x_ref, xh_ref, w_ref, p_ref, out_ref, xbuf, *,
                          offsets, fuse_taps):
    """Pass 2: recompute conv, y*scale + shift, PReLU (alpha==1 when linear); one store."""
    tm = x_ref.shape[1]
    hb = xh_ref.shape[1]
    xbuf[:, :tm] = x_ref[...]
    xbuf[:, tm:tm + hb] = xh_ref[...]

    y = _conv_tile(xbuf, w_ref, offsets=offsets, tm=tm, fuse_taps=fuse_taps)

    pv = p_ref[...]                          # (2*Cout, 4): scale / shift / alpha / pad
    z = y * pv[:, 0:1] + pv[:, 1:2]
    out_ref[...] = jnp.where(z > 0, z, pv[:, 2:3] * z)


def complex_conv_block(x, params, *, stride, padding, linear=False,
                       compute_dtype=jnp.bfloat16, tile_m=2048, min_tiles=4,
                       vmem_budget_bytes=24 * 1024 * 1024):
    """Forward of ComplexConvBlock.  x: (N, 2, Cin, H, W) float32."""
    wr = params["w_real"]                               # (Cout, Cin, kh, kw)
    wi = params["w_imag"]
    Cout, Cin, kh, kw = wr.shape
    N, two, Cin_x, H, W = x.shape
    assert two == 2 and Cin_x == Cin
    if stride != 1:
        # TODO(synk): stride>1 / depthwise variants (would need strided gather).
        raise NotImplementedError("only stride=1, groups=1 is implemented")
    if not linear:
        # nn.PReLU(out_planes) applied to the 5-D (N,2,C,H,W) tensor indexes dim 1
        # (real/imag), which only works in PyTorch when out_planes == 2.
        assert Cout == 2, "PReLU path requires out_planes == 2"

    Hp, Wp = H + 2 * padding, W + 2 * padding
    Ho, Wo = Hp - kh + 1, Wp - kw + 1
    M = N * Ho * Wo                                     # valid output positions
    Mp = N * Hp * Wp                                    # padded-grid positions (lane axis)
    Co2, Ci2 = 2 * Cout, 2 * Cin
    Kc = kh * kw * Ci2
    fuse_taps = Ci2 >= 128                              # fused im2col GEMM only when wide

    # ---- tiling: M on the lane axis; TM a multiple of the (128-aligned) halo ----
    bytes_cd = jnp.dtype(compute_dtype).itemsize
    max_off = (kh - 1) * Wp + (kw - 1)
    HB = _round_up(max(max_off, 1), 128)
    # Keep >= min_tiles grid steps on small inputs so "parallel" can shard over
    # both v7x TensorCores; big inputs just use tile_m.
    cap = max(HB, (Mp // max(min_tiles, 1)) // HB * HB)
    TM = max(HB, min(_round_up(tile_m, HB), cap))

    try:
        vmem_cap = int(pltpu.get_tpu_info().vmem_capacity_bytes)
    except Exception:                                   # conservative fallback (v7x: 64 MiB)
        vmem_cap = 64 * 1024 * 1024
    budget = min(vmem_budget_bytes, vmem_cap // 4)

    def footprint(tm_):
        return (3 * Ci2 * (tm_ + HB) * bytes_cd         # x dbl-buffer + halo + stitch scratch
                + 2 * Co2 * tm_ * 4                     # pass-2 output double buffer (f32)
                + (Kc * tm_ * bytes_cd if fuse_taps else 0)  # fused im2col temp
                + 4 * Co2 * tm_ * 4                     # accumulator / temp headroom
                + Co2 * Kc * bytes_cd)
    while TM > HB and footprint(TM) > budget:
        TM -= HB
    num_tiles = -(-Mp // TM)
    L = num_tiles * TM
    vmem_limit = int(min(max(vmem_cap // 2, 32 * 1024 * 1024),
                         max(32 * 1024 * 1024, 2 * footprint(TM))))

    # ---- lane-dense flattened padded input: (2*Cin, N*Hp*Wp) (+ halo tail) ----
    xp = jnp.pad(x, ((0, 0), (0, 0), (0, 0),
                     (padding, padding), (padding, padding)))
    xf = xp.transpose(1, 2, 0, 3, 4).reshape(Ci2, Mp)
    xf = jnp.pad(xf, ((0, 0), (0, L + HB - Mp))).astype(compute_dtype)

    # ---- fused complex-conv weights W_cat = [[wr, -wi], [wi, wr]] per tap ----
    tap_blocks = []
    for ki in range(kh):
        for kj in range(kw):
            wrt, wit = wr[:, :, ki, kj], wi[:, :, ki, kj]
            tap_blocks.append(jnp.concatenate(
                [jnp.concatenate([wrt, -wit], axis=1),
                 jnp.concatenate([wit, wrt], axis=1)], axis=0))     # (Co2, Ci2)
    if fuse_taps:
        wk = jnp.concatenate(tap_blocks, axis=1).astype(compute_dtype)   # (Co2, Kc)
        w_spec = pl.BlockSpec((Co2, Kc), lambda i: (0, 0))
    else:
        wk = jnp.stack(tap_blocks, axis=0).astype(compute_dtype)    # (kh*kw, Co2, Ci2)
        w_spec = pl.BlockSpec((kh * kw, Co2, Ci2), lambda i: (0, 0, 0))

    offsets = tuple(ki * Wp + kj for ki in range(kh) for kj in range(kw))
    cparams = pltpu.CompilerParams(dimension_semantics=("parallel",),
                                   vmem_limit_bytes=vmem_limit)
    x_spec = pl.BlockSpec((Ci2, TM), lambda i: (0, i))
    halo_spec = pl.BlockSpec((Ci2, HB), lambda i: (0, (i + 1) * (TM // HB)))

    # ---- pass 1: conv + masked per-tile BN partial stats (only stats hit HBM) ----
    stats = pl.pallas_call(
        functools.partial(_stats_kernel, offsets=offsets, fuse_taps=fuse_taps,
                          hp_wp=Hp * Wp, wp=Wp, ho_wp=Ho * Wp, wo=Wo, mp=Mp),
        grid=(num_tiles,),
        in_specs=[x_spec, halo_spec, w_spec],
        out_specs=pl.BlockSpec((1, Co2, 2), lambda i: (i, 0, 0)),
        out_shape=jax.ShapeDtypeStruct((num_tiles, Co2, 2), jnp.float32),
        scratch_shapes=[pltpu.VMEM((Ci2, TM + HB), compute_dtype)],
        compiler_params=cparams,
    )(xf, xf, wk)

    # ---- fold BN stats + gamma/beta (+ PReLU alpha) into per-channel scale/shift ----
    tot = jnp.sum(stats, axis=0)                        # (Co2, 2)
    mean = tot[:, 0] / M
    # TODO(synk): E[y^2]-E[y]^2 in f32 can lose precision for very large M /
    #             far-from-zero-mean activations; use a compensated combine there.
    var = jnp.maximum(tot[:, 1] / M - mean * mean, 0.0)
    gamma = jnp.concatenate([params["bn_gamma_real"],
                             params["bn_gamma_imag"]]).astype(jnp.float32)
    beta = jnp.concatenate([params["bn_beta_real"],
                            params["bn_beta_imag"]]).astype(jnp.float32)
    scale = gamma * jax.lax.rsqrt(var + _EPS)
    shift = beta - mean * scale
    if linear:
        alpha = jnp.ones((Co2,), jnp.float32)           # PReLU disabled -> identity
    else:
        aw = params["prelu_weight"].astype(jnp.float32)  # (2,): [real, imag]
        alpha = jnp.concatenate([jnp.full((Cout,), aw[0]),
                                 jnp.full((Cout,), aw[1])])
    pvec = jnp.stack([scale, shift, alpha,
                      jnp.zeros((Co2,), jnp.float32)], axis=1)       # (Co2, 4)

    # ---- pass 2: recompute conv (MXU is idle anyway) + BN + PReLU, single store ----
    out_flat = pl.pallas_call(
        functools.partial(_conv_bn_prelu_kernel, offsets=offsets,
                          fuse_taps=fuse_taps),
        grid=(num_tiles,),
        in_specs=[x_spec, halo_spec, w_spec,
                  pl.BlockSpec((Co2, 4), lambda i: (0, 0))],
        out_specs=pl.BlockSpec((Co2, TM), lambda i: (0, i)),
        out_shape=jax.ShapeDtypeStruct((Co2, L), jnp.float32),
        scratch_shapes=[pltpu.VMEM((Ci2, TM + HB), compute_dtype)],
        compiler_params=cparams,
    )(xf, xf, wk, pvec)

    # ---- back to the PyTorch layout (N, 2, Cout, Ho, Wo) ----
    # TODO(synk): fold this depad+transpose into pass-2's out_spec plumbing.
    out = out_flat[:, :Mp].reshape(2, Cout, N, Hp, Wp)[:, :, :, :Ho, :Wo]
    return out.transpose(2, 0, 1, 3, 4)


def _reference(x, params, *, stride, padding, linear=False,
               conv_dtype=jnp.float32):
    """Pure-JAX reference mirroring the PyTorch forward (training-mode BN)."""
    wr = params["w_real"].astype(conv_dtype)
    wi = params["w_imag"].astype(conv_dtype)

    def conv(inp, w):
        return jax.lax.conv_general_dilated(
            inp.astype(conv_dtype), w, (stride, stride),
            [(padding, padding), (padding, padding)],
            dimension_numbers=("NCHW", "OIHW", "NCHW"),
            preferred_element_type=jnp.float32)

    xr, xi = x[:, 0], x[:, 1]
    cr = conv(xr, wr) - conv(xi, wi)
    ci = conv(xi, wr) + conv(xr, wi)

    def bn(a, g, b):
        mean = a.mean(axis=(0, 2, 3), keepdims=True)
        var = ((a - mean) ** 2).mean(axis=(0, 2, 3), keepdims=True)
        return ((a - mean) / jnp.sqrt(var + _EPS) * g.reshape(1, -1, 1, 1)
                + b.reshape(1, -1, 1, 1))

    yr = bn(cr, params["bn_gamma_real"], params["bn_beta_real"])
    yi = bn(ci, params["bn_gamma_imag"], params["bn_beta_imag"])
    out = jnp.stack([yr, yi], axis=1)
    if not linear:
        a = params["prelu_weight"].reshape(1, 2, 1, 1, 1)
        out = jnp.where(out > 0, out, a * out)
    return out


if __name__ == "__main__":
    # ComplexConvBlock(in_planes=4, out_planes=2, kernel_size=3, stride=1,
    #                  padding=1, dw=False, linear=False)
    in_planes, out_planes = 4, 2
    kernel_size, stride, padding = 3, 1, 1
    N, H, W = 2, 16, 16

    key = jax.random.PRNGKey(0)
    ks = jax.random.split(key, 8)
    x = jax.random.normal(ks[0], (N, 2, in_planes, H, W), jnp.float32)

    wshape = (out_planes, in_planes, kernel_size, kernel_size)
    params = {
        "w_real": 0.1 * jax.random.normal(ks[1], wshape, jnp.float32),
        "w_imag": 0.1 * jax.random.normal(ks[2], wshape, jnp.float32),
        "bn_gamma_real": 1.0 + 0.1 * jax.random.normal(ks[3], (out_planes,), jnp.float32),
        "bn_beta_real": 0.1 * jax.random.normal(ks[4], (out_planes,), jnp.float32),
        "bn_gamma_imag": 1.0 + 0.1 * jax.random.normal(ks[5], (out_planes,), jnp.float32),
        "bn_beta_imag": 0.1 * jax.random.normal(ks[6], (out_planes,), jnp.float32),
        # nn.PReLU(out_planes) weight, default init 0.25, perturbed deterministically.
        "prelu_weight": (jnp.full((out_planes,), 0.25, jnp.float32)
                         + 0.05 * jax.random.normal(ks[7], (out_planes,), jnp.float32)),
    }

    # --- exact-semantics check: f32 operands vs full-f32 reference ---
    fwd_f32 = jax.jit(functools.partial(
        complex_conv_block, stride=stride, padding=padding, linear=False,
        compute_dtype=jnp.float32))
    out_f32 = jax.block_until_ready(fwd_f32(x, params))
    assert out_f32.shape == (N, 2, out_planes, H, W), out_f32.shape
    ref_f32 = _reference(x, params, stride=stride, padding=padding, linear=False)
    err_f32 = float(jnp.max(jnp.abs(out_f32 - ref_f32)))
    if err_f32 > 5e-4:
        raise SystemExit(f"f32 mismatch vs reference: max abs err {err_f32}")

    # --- performance default: bf16 matmul operands (f32 accumulation), checked
    #     against a reference using the same operand precision ---
    fwd_bf16 = jax.jit(functools.partial(
        complex_conv_block, stride=stride, padding=padding, linear=False,
        compute_dtype=jnp.bfloat16))
    out_bf16 = jax.block_until_ready(fwd_bf16(x, params))
    ref_bf16 = _reference(x, params, stride=stride, padding=padding,
                          linear=False, conv_dtype=jnp.bfloat16)
    err_bf16 = float(jnp.max(jnp.abs(out_bf16 - ref_bf16)))
    if err_bf16 > 2e-3:
        raise SystemExit(f"bf16 mismatch vs bf16 reference: max abs err {err_bf16}")

    print("KERNEL_OK")
</pallas_src>

<mosaic_0001>
module attributes {stable_mosaic.version = 11 : i64} {
  func.func @_conv_bn_prelu_kernel(%arg0: i32, %arg1: memref<8x128xf32, #tpu.memory_space<vmem>>, %arg2: memref<8x128xf32, #tpu.memory_space<vmem>>, %arg3: memref<9x4x8xf32, #tpu.memory_space<vmem>>, %arg4: memref<4x4xf32, #tpu.memory_space<vmem>>, %arg5: memref<4x128xf32, #tpu.memory_space<vmem>>, %arg6: memref<8x256xf32, #tpu.memory_space<vmem>>) attributes {dimension_semantics = [#tpu.dimension_semantics<parallel>], iteration_bounds = array<i64: 6>, scalar_prefetch = 0 : i64, scratch_operands = 1 : i64, tpu.core_type = #tpu.core_type<tc>, window_params = [{transform_indices = @transform_0, window_bounds = array<i64: 8, 128>}, {transform_indices = @transform_1, window_bounds = array<i64: 8, 128>}, {pipeline_mode = #tpu.pipeline_mode<synchronous>, transform_indices = @transform_2, window_bounds = array<i64: 9, 4, 8>}, {pipeline_mode = #tpu.pipeline_mode<synchronous>, transform_indices = @transform_3, window_bounds = array<i64: 4, 4>}, {transform_indices = @transform_4, window_bounds = array<i64: 4, 128>}]} {
    %c0 = arith.constant 0 : index
    %c0_0 = arith.constant 0 : index
    %0 = vector.load %arg1[%c0, %c0_0] : memref<8x128xf32, #tpu.memory_space<vmem>>, vector<8x128xf32>
    %c0_1 = arith.constant 0 : index
    %c0_2 = arith.constant 0 : index
    %1 = vector.load %arg6[%c0_1, %c0_2] : memref<8x256xf32, #tpu.memory_space<vmem>>, vector<8x128xf32>
    tpu.vector_store %arg6[%c0_1, %c0_2], %0 {strides = array<i32>} : memref<8x256xf32, #tpu.memory_space<vmem>>, vector<8x128xf32>,
    %c0_3 = arith.constant 0 : index
    %c0_4 = arith.constant 0 : index
    %2 = vector.load %arg2[%c0_3, %c0_4] : memref<8x128xf32, #tpu.memory_space<vmem>>, vector<8x128xf32>
    %c0_5 = arith.constant 0 : index
    %c128 = arith.constant 128 : index
    %3 = vector.load %arg6[%c0_5, %c128] : memref<8x256xf32, #tpu.memory_space<vmem>>, vector<8x128xf32>
    tpu.vector_store %arg6[%c0_5, %c128], %2 {strides = array<i32>} : memref<8x256xf32, #tpu.memory_space<vmem>>, vector<8x128xf32>,
    %c0_6 = arith.constant 0 : index
    %c0_7 = arith.constant 0 : index
    %c0_8 = arith.constant 0 : index
    %4 = vector.load %arg3[%c0_6, %c0_7, %c0_8] : memref<9x4x8xf32, #tpu.memory_space<vmem>>, vector<1x4x8xf32>
    %5 = vector.shape_cast %4 : vector<1x4x8xf32> to vector<4x8xf32>
    %c0_9 = arith.constant 0 : index
    %c0_10 = arith.constant 0 : index
    %6 = vector.load %arg6[%c0_9, %c0_10] : memref<8x256xf32, #tpu.memory_space<vmem>>, vector<8x128xf32>
    %cst = arith.constant dense<0.000000e+00> : vector<4x128xf32>
    %7 = tpu.matmul %5, %6, %cst {dimension_numbers = #tpu.dot_dimension_numbers<[1], [0], [0], [1], [0, 0, 1, 1], [], []>} : vector<4x8xf32>, vector<8x128xf32>, vector<4x128xf32> -> vector<4x128xf32>
    %c1 = arith.constant 1 : index
    %c0_11 = arith.constant 0 : index
    %c0_12 = arith.constant 0 : index
    %8 = vector.load %arg3[%c1, %c0_11, %c0_12] : memref<9x4x8xf32, #tpu.memory_space<vmem>>, vector<1x4x8xf32>
    %9 = vector.shape_cast %8 : vector<1x4x8xf32> to vector<4x8xf32>
    %c0_13 = arith.constant 0 : index
    %c1_14 = arith.constant 1 : index
    %10 = vector.load %arg6[%c0_13, %c1_14] : memref<8x256xf32, #tpu.memory_space<vmem>>, vector<8x128xf32>
    %cst_15 = arith.constant dense<0.000000e+00> : vector<4x128xf32>
    %11 = tpu.matmul %9, %10, %cst_15 {dimension_numbers = #tpu.dot_dimension_numbers<[1], [0], [0], [1], [0, 0, 1, 1], [], []>} : vector<4x8xf32>, vector<8x128xf32>, vector<4x128xf32> -> vector<4x128xf32>
    %12 = arith.addf %7, %11 : vector<4x128xf32>
    %c2 = arith.constant 2 : index
    %c0_16 = arith.constant 0 : index
    %c0_17 = arith.constant 0 : index
    %13 = vector.load %arg3[%c2, %c0_16, %c0_17] : memref<9x4x8xf32, #tpu.memory_space<vmem>>, vector<1x4x8xf32>
    %14 = vector.shape_cast %13 : vector<1x4x8xf32> to vector<4x8xf32>
    %c0_18 = arith.constant 0 : index
    %c2_19 = arith.constant 2 : index
    %15 = vector.load %arg6[%c0_18, %c2_19] : memref<8x256xf32, #tpu.memory_space<vmem>>, vector<8x128xf32>
    %cst_20 = arith.constant dense<0.000000e+00> : vector<4x128xf32>
    %16 = tpu.matmul %14, %15, %cst_20 {dimension_numbers = #tpu.dot_dimension_numbers<[1], [0], [0], [1], [0, 0, 1, 1], [], []>} : vector<4x8xf32>, vector<8x128xf32>, vector<4x128xf32> -> vector<4x128xf32>
    %17 = arith.addf %12, %16 : vector<4x128xf32>
    %c3 = arith.constant 3 : index
    %c0_21 = arith.constant 0 : index
    %c0_22 = arith.constant 0 : index
    %18 = vector.load %arg3[%c3, %c0_21, %c0_22] : memref<9x4x8xf32, #tpu.memory_space<vmem>>, vector<1x4x8xf32>
    %19 = vector.shape_cast %18 : vector<1x4x8xf32> to vector<4x8xf32>
    %c0_23 = arith.constant 0 : index
    %c18 = arith.constant 18 : index
    %20 = vector.load %arg6[%c0_23, %c18] : memref<8x256xf32, #tpu.memory_space<vmem>>, vector<8x128xf32>
    %cst_24 = arith.constant dense<0.000000e+00> : vector<4x128xf32>
    %21 = tpu.matmul %19, %20, %cst_24 {dimension_numbers = #tpu.dot_dimension_numbers<[1], [0], [0], [1], [0, 0, 1, 1], [], []>} : vector<4x8xf32>, vector<8x128xf32>, vector<4x128xf32> -> vector<4x128xf32>
    %22 = arith.addf %17, %21 : vector<4x128xf32>
    %c4 = arith.constant 4 : index
    %c0_25 = arith.constant 0 : index
    %c0_26 = arith.constant 0 : index
    %23 = vector.load %arg3[%c4, %c0_25, %c0_26] : memref<9x4x8xf32, #tpu.memory_space<vmem>>, vector<1x4x8xf32>
    %24 = vector.shape_cast %23 : vector<1x4x8xf32> to vector<4x8xf32>
    %c0_27 = arith.constant 0 : index
    %c19 = arith.constant 19 : index
    %25 = vector.load %arg6[%c0_27, %c19] : memref<8x256xf32, #tpu.memory_space<vmem>>, vector<8x128xf32>
    %cst_28 = arith.constant dense<0.000000e+00> : vector<4x128xf32>
    %26 = tpu.matmul %24, %25, %cst_28 {dimension_numbers = #tpu.dot_dimension_numbers<[1], [0], [0], [1], [0, 0, 1, 1], [], []>} : vector<4x8xf32>, vector<8x128xf32>, vector<4x128xf32> -> vector<4x128xf32>
    %27 = arith.addf %22, %26 : vector<4x128xf32>
    %c5 = arith.constant 5 : index
    %c0_29 = arith.constant 0 : index
    %c0_30 = arith.constant 0 : index
    %28 = vector.load %arg3[%c5, %c0_29, %c0_30] : memref<9x4x8xf32, #tpu.memory_space<vmem>>, vector<1x4x8xf32>
    %29 = vector.shape_cast %28 : vector<1x4x8xf32> to vector<4x8xf32>
    %c0_31 = arith.constant 0 : index
    %c20 = arith.constant 20 : index
    %30 = vector.load %arg6[%c0_31, %c20] : memref<8x256xf32, #tpu.memory_space<vmem>>, vector<8x128xf32>
    %cst_32 = arith.constant dense<0.000000e+00> : vector<4x128xf32>
    %31 = tpu.matmul %29, %30, %cst_32 {dimension_numbers = #tpu.dot_dimension_numbers<[1], [0], [0], [1], [0, 0, 1, 1], [], []>} : vector<4x8xf32>, vector<8x128xf32>, vector<4x128xf32> -> vector<4x128xf32>
    %32 = arith.addf %27, %31 : vector<4x128xf32>
    %c6 = arith.constant 6 : index
    %c0_33 = arith.constant 0 : index
    %c0_34 = arith.constant 0 : index
    %33 = vector.load %arg3[%c6, %c0_33, %c0_34] : memref<9x4x8xf32, #tpu.memory_space<vmem>>, vector<1x4x8xf32>
    %34 = vector.shape_cast %33 : vector<1x4x8xf32> to vector<4x8xf32>
    %c0_35 = arith.constant 0 : index
    %c36 = arith.constant 36 : index
    %35 = vector.load %arg6[%c0_35, %c36] : memref<8x256xf32, #tpu.memory_space<vmem>>, vector<8x128xf32>
    %cst_36 = arith.constant dense<0.000000e+00> : vector<4x128xf32>
    %36 = tpu.matmul %34, %35, %cst_36 {dimension_numbers = #tpu.dot_dimension_numbers<[1], [0], [0], [1], [0, 0, 1, 1], [], []>} : vector<4x8xf32>, vector<8x128xf32>, vector<4x128xf32> -> vector<4x128xf32>
    %37 = arith.addf %32, %36 : vector<4x128xf32>
    %c7 = arith.constant 7 : index
    %c0_37 = arith.constant 0 : index
    %c0_38 = arith.constant 0 : index
    %38 = vector.load %arg3[%c7, %c0_37, %c0_38] : memref<9x4x8xf32, #tpu.memory_space<vmem>>, vector<1x4x8xf32>
    %39 = vector.shape_cast %38 : vector<1x4x8xf32> to vector<4x8xf32>
    %c0_39 = arith.constant 0 : index
    %c37 = arith.constant 37 : index
    %40 = vector.load %arg6[%c0_39, %c37] : memref<8x256xf32, #tpu.memory_space<vmem>>, vector<8x128xf32>
    %cst_40 = arith.constant dense<0.000000e+00> : vector<4x128xf32>
    %41 = tpu.matmul %39, %40, %cst_40 {dimension_numbers = #tpu.dot_dimension_numbers<[1], [0], [0], [1], [0, 0, 1, 1], [], []>} : vector<4x8xf32>, vector<8x128xf32>, vector<4x128xf32> -> vector<4x128xf32>
    %42 = arith.addf %37, %41 : vector<4x128xf32>
    %c8 = arith.constant 8 : index
    %c0_41 = arith.constant 0 : index
    %c0_42 = arith.constant 0 : index
    %43 = vector.load %arg3[%c8, %c0_41, %c0_42] : memref<9x4x8xf32, #tpu.memory_space<vmem>>, vector<1x4x8xf32>
    %44 = vector.shape_cast %43 : vector<1x4x8xf32> to vector<4x8xf32>
    %c0_43 = arith.constant 0 : index
    %c38 = arith.constant 38 : index
    %45 = vector.load %arg6[%c0_43, %c38] : memref<8x256xf32, #tpu.memory_space<vmem>>, vector<8x128xf32>
    %cst_44 = arith.constant dense<0.000000e+00> : vector<4x128xf32>
    %46 = tpu.matmul %44, %45, %cst_44 {dimension_numbers = #tpu.dot_dimension_numbers<[1], [0], [0], [1], [0, 0, 1, 1], [], []>} : vector<4x8xf32>, vector<8x128xf32>, vector<4x128xf32> -> vector<4x128xf32>
    %47 = arith.addf %42, %46 : vector<4x128xf32>
    %c0_45 = arith.constant 0 : index
    %c0_46 = arith.constant 0 : index
    %48 = vector.load %arg4[%c0_45, %c0_46] : memref<4x4xf32, #tpu.memory_space<vmem>>, vector<4x4xf32>
    %49 = vector.extract_strided_slice %48 {offsets = [0, 0], sizes = [4, 1], strides = [1, 1]} : vector<4x4xf32> to vector<4x1xf32>
    %50 = vector.broadcast %49 : vector<4x1xf32> to vector<4x128xf32>
    %51 = arith.mulf %47, %50 : vector<4x128xf32>
    %52 = vector.extract_strided_slice %48 {offsets = [0, 1], sizes = [4, 1], strides = [1, 1]} : vector<4x4xf32> to vector<4x1xf32>
    %53 = vector.broadcast %52 : vector<4x1xf32> to vector<4x128xf32>
    %54 = arith.addf %51, %53 : vector<4x128xf32>
    %cst_47 = arith.constant 0.000000e+00 : f32
    %55 = vector.broadcast %cst_47 : f32 to vector<4x128xf32>
    %56 = arith.cmpf ogt, %54, %55 : vector<4x128xf32>
    %57 = vector.extract_strided_slice %48 {offsets = [0, 2], sizes = [4, 1], strides = [1, 1]} : vector<4x4xf32> to vector<4x1xf32>
    %58 = vector.broadcast %57 : vector<4x1xf32> to vector<4x128xf32>
    %59 = arith.mulf %58, %54 : vector<4x128xf32>
    %60 = arith.select %56, %54, %59 : vector<4x128xi1>, vector<4x128xf32>
    %c0_48 = arith.constant 0 : index
    %c0_49 = arith.constant 0 : index
    %61 = vector.load %arg5[%c0_48, %c0_49] : memref<4x128xf32, #tpu.memory_space<vmem>>, vector<4x128xf32>
    tpu.vector_store %arg5[%c0_48, %c0_49], %60 {strides = array<i32>} : memref<4x128xf32, #tpu.memory_space<vmem>>, vector<4x128xf32>,
    return
  }
  func.func @transform_0(%arg0: i32) -> (i32, i32) {
    %c0_i32 = arith.constant 0 : i32
    %c0_i32_0 = arith.constant 0 : i32
    return %c0_i32, %arg0 : i32, i32
  }
  func.func @transform_1(%arg0: i32) -> (i32, i32) {
    %c1_i32 = arith.constant 1 : i32
    %0 = arith.addi %arg0, %c1_i32 : i32
    %c1_i32_0 = arith.constant 1 : i32
    %1 = arith.muli %0, %c1_i32_0 : i32
    %c0_i32 = arith.constant 0 : i32
    %c0_i32_1 = arith.constant 0 : i32
    return %c0_i32, %1 : i32, i32
  }
  func.func @transform_2(%arg0: i32) -> (i32, i32, i32) {
    %c0_i32 = arith.constant 0 : i32
    %c0_i32_0 = arith.constant 0 : i32
    %c0_i32_1 = arith.constant 0 : i32
    %c0_i32_2 = arith.constant 0 : i32
    return %c0_i32, %c0_i32_0, %c0_i32_1 : i32, i32, i32
  }
  func.func @transform_3(%arg0: i32) -> (i32, i32) {
    %c0_i32 = arith.constant 0 : i32
    %c0_i32_0 = arith.constant 0 : i32
    %c0_i32_1 = arith.constant 0 : i32
    return %c0_i32, %c0_i32_0 : i32, i32
  }
  func.func @transform_4(%arg0: i32) -> (i32, i32) {
    %c0_i32 = arith.constant 0 : i32
    %c0_i32_0 = arith.constant 0 : i32
    return %c0_i32, %arg0 : i32, i32
  }
}

module attributes {stable_mosaic.version = 11 : i64} {
  func.func @_stats_kernel(%arg0: i32, %arg1: memref<8x128xf32, #tpu.memory_space<vmem>>, %arg2: memref<8x128xf32, #tpu.memory_space<vmem>>, %arg3: memref<9x4x8xf32, #tpu.memory_space<vmem>>, %arg4: memref<1x4x2xf32, #tpu.memory_space<vmem>>, %arg5: memref<8x256xf32, #tpu.memory_space<vmem>>) attributes {dimension_semantics = [#tpu.dimension_semantics<parallel>], iteration_bounds = array<i64: 6>, scalar_prefetch = 0 : i64, scratch_operands = 1 : i64, tpu.core_type = #tpu.core_type<tc>, window_params = [{transform_indices = @transform_0, window_bounds = array<i64: 8, 128>}, {transform_indices = @transform_1, window_bounds = array<i64: 8, 128>}, {pipeline_mode = #tpu.pipeline_mode<synchronous>, transform_indices = @transform_2, window_bounds = array<i64: 9, 4, 8>}, {transform_indices = @transform_3, window_bounds = array<i64: 1, 4, 2>}]} {
    %c0 = arith.constant 0 : index
    %c0_0 = arith.constant 0 : index
    %0 = vector.load %arg1[%c0, %c0_0] : memref<8x128xf32, #tpu.memory_space<vmem>>, vector<8x128xf32>
    %c0_1 = arith.constant 0 : index
    %c0_2 = arith.constant 0 : index
    %1 = vector.load %arg5[%c0_1, %c0_2] : memref<8x256xf32, #tpu.memory_space<vmem>>, vector<8x128xf32>
    tpu.vector_store %arg5[%c0_1, %c0_2], %0 {strides = array<i32>} : memref<8x256xf32, #tpu.memory_space<vmem>>, vector<8x128xf32>,
    %c0_3 = arith.constant 0 : index
    %c0_4 = arith.constant 0 : index
    %2 = vector.load %arg2[%c0_3, %c0_4] : memref<8x128xf32, #tpu.memory_space<vmem>>, vector<8x128xf32>
    %c0_5 = arith.constant 0 : index
    %c128 = arith.constant 128 : index
    %3 = vector.load %arg5[%c0_5, %c128] : memref<8x256xf32, #tpu.memory_space<vmem>>, vector<8x128xf32>
    tpu.vector_store %arg5[%c0_5, %c128], %2 {strides = array<i32>} : memref<8x256xf32, #tpu.memory_space<vmem>>, vector<8x128xf32>,
    %c0_6 = arith.constant 0 : index
    %c0_7 = arith.constant 0 : index
    %c0_8 = arith.constant 0 : index
    %4 = vector.load %arg3[%c0_6, %c0_7, %c0_8] : memref<9x4x8xf32, #tpu.memory_space<vmem>>, vector<1x4x8xf32>
    %5 = vector.shape_cast %4 : vector<1x4x8xf32> to vector<4x8xf32>
    %c0_9 = arith.constant 0 : index
    %c0_10 = arith.constant 0 : index
    %6 = vector.load %arg5[%c0_9, %c0_10] : memref<8x256xf32, #tpu.memory_space<vmem>>, vector<8x128xf32>
    %cst = arith.constant dense<0.000000e+00> : vector<4x128xf32>
    %7 = tpu.matmul %5, %6, %cst {dimension_numbers = #tpu.dot_dimension_numbers<[1], [0], [0], [1], [0, 0, 1, 1], [], []>} : vector<4x8xf32>, vector<8x128xf32>, vector<4x128xf32> -> vector<4x128xf32>
    %c1 = arith.constant 1 : index
    %c0_11 = arith.constant 0 : index
    %c0_12 = arith.constant 0 : index
    %8 = vector.load %arg3[%c1, %c0_11, %c0_12] : memref<9x4x8xf32, #tpu.memory_space<vmem>>, vector<1x4x8xf32>
    %9 = vector.shape_cast %8 : vector<1x4x8xf32> to vector<4x8xf32>
    %c0_13 = arith.constant 0 : index
    %c1_14 = arith.constant 1 : index
    %10 = vector.load %arg5[%c0_13, %c1_14] : memref<8x256xf32, #tpu.memory_space<vmem>>, vector<8x128xf32>
    %cst_15 = arith.constant dense<0.000000e+00> : vector<4x128xf32>
    %11 = tpu.matmul %9, %10, %cst_15 {dimension_numbers = #tpu.dot_dimension_numbers<[1], [0], [0], [1], [0, 0, 1, 1], [], []>} : vector<4x8xf32>, vector<8x128xf32>, vector<4x128xf32> -> vector<4x128xf32>
    %12 = arith.addf %7, %11 : vector<4x128xf32>
    %c2 = arith.constant 2 : index
    %c0_16 = arith.constant 0 : index
    %c0_17 = arith.constant 0 : index
    %13 = vector.load %arg3[%c2, %c0_16, %c0_17] : memref<9x4x8xf32, #tpu.memory_space<vmem>>, vector<1x4x8xf32>
    %14 = vector.shape_cast %13 : vector<1x4x8xf32> to vector<4x8xf32>
    %c0_18 = arith.constant 0 : index
    %c2_19 = arith.constant 2 : index
    %15 = vector.load %arg5[%c0_18, %c2_19] : memref<8x256xf32, #tpu.memory_space<vmem>>, vector<8x128xf32>
    %cst_20 = arith.constant dense<0.000000e+00> : vector<4x128xf32>
    %16 = tpu.matmul %14, %15, %cst_20 {dimension_numbers = #tpu.dot_dimension_numbers<[1], [0], [0], [1], [0, 0, 1, 1], [], []>} : vector<4x8xf32>, vector<8x128xf32>, vector<4x128xf32> -> vector<4x128xf32>
    %17 = arith.addf %12, %16 : vector<4x128xf32>
    %c3 = arith.constant 3 : index
    %c0_21 = arith.constant 0 : index
    %c0_22 = arith.constant 0 : index
    %18 = vector.load %arg3[%c3, %c0_21, %c0_22] : memref<9x4x8xf32, #tpu.memory_space<vmem>>, vector<1x4x8xf32>
    %19 = vector.shape_cast %18 : vector<1x4x8xf32> to vector<4x8xf32>
    %c0_23 = arith.constant 0 : index
    %c18 = arith.constant 18 : index
    %20 = vector.load %arg5[%c0_23, %c18] : memref<8x256xf32, #tpu.memory_space<vmem>>, vector<8x128xf32>
    %cst_24 = arith.constant dense<0.000000e+00> : vector<4x128xf32>
    %21 = tpu.matmul %19, %20, %cst_24 {dimension_numbers = #tpu.dot_dimension_numbers<[1], [0], [0], [1], [0, 0, 1, 1], [], []>} : vector<4x8xf32>, vector<8x128xf32>, vector<4x128xf32> -> vector<4x128xf32>
    %22 = arith.addf %17, %21 : vector<4x128xf32>
    %c4 = arith.constant 4 : index
    %c0_25 = arith.constant 0 : index
    %c0_26 = arith.constant 0 : index
    %23 = vector.load %arg3[%c4, %c0_25, %c0_26] : memref<9x4x8xf32, #tpu.memory_space<vmem>>, vector<1x4x8xf32>
    %24 = vector.shape_cast %23 : vector<1x4x8xf32> to vector<4x8xf32>
    %c0_27 = arith.constant 0 : index
    %c19 = arith.constant 19 : index
    %25 = vector.load %arg5[%c0_27, %c19] : memref<8x256xf32, #tpu.memory_space<vmem>>, vector<8x128xf32>
    %cst_28 = arith.constant dense<0.000000e+00> : vector<4x128xf32>
    %26 = tpu.matmul %24, %25, %cst_28 {dimension_numbers = #tpu.dot_dimension_numbers<[1], [0], [0], [1], [0, 0, 1, 1], [], []>} : vector<4x8xf32>, vector<8x128xf32>, vector<4x128xf32> -> vector<4x128xf32>
    %27 = arith.addf %22, %26 : vector<4x128xf32>
    %c5 = arith.constant 5 : index
    %c0_29 = arith.constant 0 : index
    %c0_30 = arith.constant 0 : index
    %28 = vector.load %arg3[%c5, %c0_29, %c0_30] : memref<9x4x8xf32, #tpu.memory_space<vmem>>, vector<1x4x8xf32>
    %29 = vector.shape_cast %28 : vector<1x4x8xf32> to vector<4x8xf32>
    %c0_31 = arith.constant 0 : index
    %c20 = arith.constant 20 : index
    %30 = vector.load %arg5[%c0_31, %c20] : memref<8x256xf32, #tpu.memory_space<vmem>>, vector<8x128xf32>
    %cst_32 = arith.constant dense<0.000000e+00> : vector<4x128xf32>
    %31 = tpu.matmul %29, %30, %cst_32 {dimension_numbers = #tpu.dot_dimension_numbers<[1], [0], [0], [1], [0, 0, 1, 1], [], []>} : vector<4x8xf32>, vector<8x128xf32>, vector<4x128xf32> -> vector<4x128xf32>
    %32 = arith.addf %27, %31 : vector<4x128xf32>
    %c6 = arith.constant 6 : index
    %c0_33 = arith.constant 0 : index
    %c0_34 = arith.constant 0 : index
    %33 = vector.load %arg3[%c6, %c0_33, %c0_34] : memref<9x4x8xf32, #tpu.memory_space<vmem>>, vector<1x4x8xf32>
    %34 = vector.shape_cast %33 : vector<1x4x8xf32> to vector<4x8xf32>
    %c0_35 = arith.constant 0 : index
    %c36 = arith.constant 36 : index
    %35 = vector.load %arg5[%c0_35, %c36] : memref<8x256xf32, #tpu.memory_space<vmem>>, vector<8x128xf32>
    %cst_36 = arith.constant dense<0.000000e+00> : vector<4x128xf32>
    %36 = tpu.matmul %34, %35, %cst_36 {dimension_numbers = #tpu.dot_dimension_numbers<[1], [0], [0], [1], [0, 0, 1, 1], [], []>} : vector<4x8xf32>, vector<8x128xf32>, vector<4x128xf32> -> vector<4x128xf32>
    %37 = arith.addf %32, %36 : vector<4x128xf32>
    %c7 = arith.constant 7 : index
    %c0_37 = arith.constant 0 : index
    %c0_38 = arith.constant 0 : index
    %38 = vector.load %arg3[%c7, %c0_37, %c0_38] : memref<9x4x8xf32, #tpu.memory_space<vmem>>, vector<1x4x8xf32>
    %39 = vector.shape_cast %38 : vector<1x4x8xf32> to vector<4x8xf32>
    %c0_39 = arith.constant 0 : index
    %c37 = arith.constant 37 : index
    %40 = vector.load %arg5[%c0_39, %c37] : memref<8x256xf32, #tpu.memory_space<vmem>>, vector<8x128xf32>
    %cst_40 = arith.constant dense<0.000000e+00> : vector<4x128xf32>
    %41 = tpu.matmul %39, %40, %cst_40 {dimension_numbers = #tpu.dot_dimension_numbers<[1], [0], [0], [1], [0, 0, 1, 1], [], []>} : vector<4x8xf32>, vector<8x128xf32>, vector<4x128xf32> -> vector<4x128xf32>
    %42 = arith.addf %37, %41 : vector<4x128xf32>
    %c8 = arith.constant 8 : index
    %c0_41 = arith.constant 0 : index
    %c0_42 = arith.constant 0 : index
    %43 = vector.load %arg3[%c8, %c0_41, %c0_42] : memref<9x4x8xf32, #tpu.memory_space<vmem>>, vector<1x4x8xf32>
    %44 = vector.shape_cast %43 : vector<1x4x8xf32> to vector<4x8xf32>
    %c0_43 = arith.constant 0 : index
    %c38 = arith.constant 38 : index
    %45 = vector.load %arg5[%c0_43, %c38] : memref<8x256xf32, #tpu.memory_space<vmem>>, vector<8x128xf32>
    %cst_44 = arith.constant dense<0.000000e+00> : vector<4x128xf32>
    %46 = tpu.matmul %44, %45, %cst_44 {dimension_numbers = #tpu.dot_dimension_numbers<[1], [0], [0], [1], [0, 0, 1, 1], [], []>} : vector<4x8xf32>, vector<8x128xf32>, vector<4x128xf32> -> vector<4x128xf32>
    %47 = arith.addf %42, %46 : vector<4x128xf32>
    %c128_i32 = arith.constant 128 : i32
    %48 = arith.muli %arg0, %c128_i32 : i32
    %49 = tpu.iota {dimensions = array<i32: 1>} : vector<1x128xi32>
    %50 = vector.broadcast %48 : i32 to vector<1x128xi32>
    %51 = arith.addi %50, %49 : vector<1x128xi32>
    %52 = arith.sitofp %51 : vector<1x128xi32> to vector<1x128xf32>
    %cst_45 = arith.constant 0.00308641978 : f32
    %53 = vector.broadcast %cst_45 : f32 to vector<1x128xf32>
    %54 = arith.mulf %52, %53 : vector<1x128xf32>
    %55 = math.floor %54 : vector<1x128xf32>
    %56 = arith.fptosi %55 : vector<1x128xf32> to vector<1x128xi32>
    %c324_i32 = arith.constant 324 : i32
    %57 = vector.broadcast %c324_i32 : i32 to vector<1x128xi32>
    %58 = arith.muli %56, %57 : vector<1x128xi32>
    %59 = arith.subi %51, %58 : vector<1x128xi32>
    %c0_i32 = arith.constant 0 : i32
    %60 = vector.broadcast %c0_i32 : i32 to vector<1x128xi32>
    %61 = arith.cmpi slt, %59, %60 : vector<1x128xi32>
    %c324_i32_46 = arith.constant 324 : i32
    %62 = vector.broadcast %c324_i32_46 : i32 to vector<1x128xi32>
    %63 = arith.addi %59, %62 : vector<1x128xi32>
    %64 = arith.select %61, %63, %59 : vector<1x128xi1>, vector<1x128xi32>
    %c324_i32_47 = arith.constant 324 : i32
    %65 = vector.broadcast %c324_i32_47 : i32 to vector<1x128xi32>
    %66 = arith.cmpi sge, %64, %65 : vector<1x128xi32>
    %c324_i32_48 = arith.constant 324 : i32
    %67 = vector.broadcast %c324_i32_48 : i32 to vector<1x128xi32>
    %68 = arith.subi %64, %67 : vector<1x128xi32>
    %69 = arith.select %66, %68, %64 : vector<1x128xi1>, vector<1x128xi32>
    %70 = arith.sitofp %69 : vector<1x128xi32> to vector<1x128xf32>
    %cst_49 = arith.constant 0.055555556 : f32
    %71 = vector.broadcast %cst_49 : f32 to vector<1x128xf32>
    %72 = arith.mulf %70, %71 : vector<1x128xf32>
    %73 = math.floor %72 : vector<1x128xf32>
    %74 = arith.fptosi %73 : vector<1x128xf32> to vector<1x128xi32>
    %c18_i32 = arith.constant 18 : i32
    %75 = vector.broadcast %c18_i32 : i32 to vector<1x128xi32>
    %76 = arith.muli %74, %75 : vector<1x128xi32>
    %77 = arith.subi %69, %76 : vector<1x128xi32>
    %c0_i32_50 = arith.constant 0 : i32
    %78 = vector.broadcast %c0_i32_50 : i32 to vector<1x128xi32>
    %79 = arith.cmpi slt, %77, %78 : vector<1x128xi32>
    %c18_i32_51 = arith.constant 18 : i32
    %80 = vector.broadcast %c18_i32_51 : i32 to vector<1x128xi32>
    %81 = arith.addi %77, %80 : vector<1x128xi32>
    %82 = arith.select %79, %81, %77 : vector<1x128xi1>, vector<1x128xi32>
    %c18_i32_52 = arith.constant 18 : i32
    %83 = vector.broadcast %c18_i32_52 : i32 to vector<1x128xi32>
    %84 = arith.cmpi sge, %82, %83 : vector<1x128xi32>
    %c18_i32_53 = arith.constant 18 : i32
    %85 = vector.broadcast %c18_i32_53 : i32 to vector<1x128xi32>
    %86 = arith.subi %82, %85 : vector<1x128xi32>
    %87 = arith.select %84, %86, %82 : vector<1x128xi1>, vector<1x128xi32>
    %c648_i32 = arith.constant 648 : i32
    %88 = vector.broadcast %c648_i32 : i32 to vector<1x128xi32>
    %89 = arith.cmpi slt, %51, %88 : vector<1x128xi32>
    %c288_i32 = arith.constant 288 : i32
    %90 = vector.broadcast %c288_i32 : i32 to vector<1x128xi32>
    %91 = arith.cmpi slt, %69, %90 : vector<1x128xi32>
    %92 = arith.andi %89, %91 : vector<1x128xi1>
    %c16_i32 = arith.constant 16 : i32
    %93 = vector.broadcast %c16_i32 : i32 to vector<1x128xi32>
    %94 = arith.cmpi slt, %87, %93 : vector<1x128xi32>
    %95 = arith.andi %92, %94 : vector<1x128xi1>
    %96 = arith.extui %95 : vector<1x128xi1> to vector<1x128xi32>
    %97 = arith.sitofp %96 : vector<1x128xi32> to vector<1x128xf32>
    %98 = vector.broadcast %97 : vector<1x128xf32> to vector<4x128xf32>
    %99 = arith.mulf %47, %98 : vector<4x128xf32>
    %cst_54 = arith.constant dense<0.000000e+00> : vector<4xf32>
    %100 = vector.multi_reduction <add>, %99, %cst_54 [1] : vector<4x128xf32> to vector<4xf32>
    %101 = vector.shape_cast %100 : vector<4xf32> to vector<4x1xf32>
    %102 = arith.mulf %99, %47 : vector<4x128xf32>
    %cst_55 = arith.constant dense<0.000000e+00> : vector<4xf32>
    %103 = vector.multi_reduction <add>, %102, %cst_55 [1] : vector<4x128xf32> to vector<4xf32>
    %104 = vector.shape_cast %103 : vector<4xf32> to vector<4x1xf32>
    %105 = tpu.concatenate %101, %104 in 1 : vector<4x1xf32>, vector<4x1xf32> -> vector<4x2xf32>
    %106 = vector.shape_cast %105 : vector<4x2xf32> to vector<1x4x2xf32>
    %c0_56 = arith.constant 0 : index
    %c0_57 = arith.constant 0 : index
    %c0_58 = arith.constant 0 : index
    %107 = vector.load %arg4[%c0_56, %c0_57, %c0_58] : memref<1x4x2xf32, #tpu.memory_space<vmem>>, vector<1x4x2xf32>
    tpu.vector_store %arg4[%c0_56, %c0_57, %c0_58], %106 {strides = array<i32>} : memref<1x4x2xf32, #tpu.memory_space<vmem>>, vector<1x4x2xf32>,
    return
  }
  func.func @transform_0(%arg0: i32) -> (i32, i32) {
    %c0_i32 = arith.constant 0 : i32
    %c0_i32_0 = arith.constant 0 : i32
    return %c0_i32, %arg0 : i32, i32
  }
  func.func @transform_1(%arg0: i32) -> (i32, i32) {
    %c1_i32 = arith.constant 1 : i32
    %0 = arith.addi %arg0, %c1_i32 : i32
    %c1_i32_0 = arith.constant 1 : i32
    %1 = arith.muli %0, %c1_i32_0 : i32
    %c0_i32 = arith.constant 0 : i32
    %c0_i32_1 = arith.constant 0 : i32
    return %c0_i32, %1 : i32, i32
  }
  func.func @transform_2(%arg0: i32) -> (i32, i32, i32) {
    %c0_i32 = arith.constant 0 : i32
    %c0_i32_0 = arith.constant 0 : i32
    %c0_i32_1 = arith.constant 0 : i32
    %c0_i32_2 = arith.constant 0 : i32
    return %c0_i32, %c0_i32_0, %c0_i32_1 : i32, i32, i32
  }
  func.func @transform_3(%arg0: i32) -> (i32, i32, i32) {
    %c0_i32 = arith.constant 0 : i32
    %c0_i32_0 = arith.constant 0 : i32
    %c0_i32_1 = arith.constant 0 : i32
    return %arg0, %c0_i32, %c0_i32_0 : i32, i32, i32
  }
}

</mosaic_0001>

<bundles_post_ra>
// kernel: complex_conv_block.3
= control target key start
LH: loop header
LB: loop body
LE: loop exit
PB: predicated region body
PF: predicated region fallthrough
CT: control target
= control target key end

     0   :  { %s1210_s15 = smov 0   ;;  %s1303_s0 = inlined_call_operand.vmem [shape: f32[8,896], index: 0, kind: input, shape index: {}, may-alias: {0,1}]   ;;  %s1304_s1 = inlined_call_operand.vmem [shape: f32[8,896], index: 1, kind: input, shape index: {}, may-alias: {0,1}]   ;;  %s1305_s2 = inlined_call_operand.vmem [shape: f32[9,4,8], index: 2, kind: input, shape index: {}]   ;;  %s1306_s3 = inlined_call_operand.vmem [shape: f32[4,4], index: 3, kind: input, shape index: {}]   ;;  %s1307_s4 = inlined_call_operand.vmem [shape: f32[4,768], index: 4, kind: output, shape index: {}]  }
   0x1 LB: > { %s1216_s16 = sadd.s32 4294967295, %s1170_s15   ;;  %p1053_p0 = scmp.ge.s32.totalorder %s1170_s15, 1  ;;  %s1170_s15 = sphi %s1210_s15, %s14_s15  }
   0x2   : > { %p174_p1 = scmp.lt.s32.totalorder %s1170_s15, 7 }
   0x4   : > { %p175_p2 = pnand %p1053_p0, %p174_p1 }
   0x5   : > { %p203_p3 = scmp.lt.s32.totalorder (!%p175_p2), %s1216_s16, 6  ;;  %s207_s17 = sadd.s32 (!%p175_p2), 1, %s1216_s16 }
   0x6   : > { %178 = sbr.rel (%p175_p2) target bundleno = 364 (0x16c), region = 36  ;;  %p208_p4 = scmp.lt.s32.totalorder (!%p175_p2), %s207_s17, 6 }
   0x7   : > { %s1174_s25 = smov (!%p175_p2), 126   ;;  %s1175_s26 = smov (!%p175_p2), 127  }
   0x8   : > { %s1176_s5 = smov (!%p175_p2), 110   ;;  %s1177_s6 = smov (!%p175_p2), 109  }
   0x9   : > { %s1178_s7 = smov (!%p175_p2), 108   ;;  %s1181_s8 = smov (!%p175_p2), 92  }
   0xa   : > { %s1182_s9 = smov (!%p175_p2), 91   ;;  %s1183_s10 = smov (!%p175_p2), 90  }
   0xb   : > { %v1172_v0 = vmov 0.0   ;;  %s204_s18 = scalar_select %p203_p3, %s1216_s16, 6  ;;  %vm1173_vm0 = vmmov 0   ;;  %v221_v2 = vld [vmem:[%s1305_s2] sm:$0xf]  ;;  %vm236_vm1 = vcmask 64512  }
   0xc   : > { %1099 = vmatprep.subr.mxu1 %v1172_v0  ;;  %1094 = vmatprep.subr.mxu0 %v1172_v0  ;;  %s1309_s17 = smov (!%p208_p4, %s207_s17), 6  ;;  %v1179_v4 = vmov 1   ;;  %v1180_v5 = vmov 0   ;;  %v964_v6 = vld [vmem:[%s1306_s3] sm:$0xf]  ;;  %v1184_v7 = vmov 2  }
   0xd   : > { %1101 = vmatprep.mubr.msk.f32.mxu1 %vm1173_vm0, %v1172_v0  ;;  %1096 = vmatprep.mubr.msk.f32.mxu0 %vm1173_vm0, %v1172_v0  ;;  %s1054_s19 = sshll.u32 %s204_s18, 3  ;;  %s1055_s27 = sshll.u32 %s1309_s17, 3  ;;  %vm472_vm2 = vcmask 900096   ;;  %vm233_vm3 = vcmask 1039360   ;;  %vm389_vm4 = vcmask 1031168   ;;  %vm555_vm5 = vcmask 891904  }
   0xe   : > { %s206_s22 = scalar_lea.vmem %s1303_s0, %s1054_s19  ;;  %s211_s30 = scalar_lea.vmem %s1304_s1, %s1055_s27  ;;  %1161 = vset.pattern.permute.xlu1 %v1179_v4  ;;  %1160 = vset.pattern.permute.xlu0 %v1180_v5  ;;  %v1057_v14 = vld [vmem:[%s1305_s2 + $0x4] sm:$0xf]  ;;  %v1062_v18 = vld [vmem:[%s1305_s2 + $0xc] sm:$0xf]  ;;  %v1060_v21 = vld [vmem:[%s1305_s2 + $0x8] sm:$0xf] }
   0xf   : > { %v217_v1 = vld [vmem:[%s206_s22] sm:$0xff]  ;;  %vm638_vm6 = vcmask 883712   ;;  %v1064_v25 = vld [vmem:[%s1305_s2 + $0x10] sm:$0xf]  ;;  %v1066_v26 = vld [vmem:[%s1305_s2 + $0x14] sm:$0xf] }
  0x10   : > { %385 = vrot.lane.b32.xlu1 %v217_v1, %s1174_s25  ;;  %229 = vrot.lane.b32.xlu0 %v217_v1, %s1175_s26  ;;  %v219_v3 = vld [vmem:[%s211_s30] sm:$0xff]  ;;  %vm721_vm7 = vcmask 752640   ;;  %v1068_v30 = vld [vmem:[%s1305_s2 + $0x18] sm:$0xf]  ;;  %vm804_vm8 = vcmask 744448   ;;  %vm887_vm9 = vcmask 736256  }
  0x11   : > { %1100 = vmatpush3.msra.mxu1 %v217_v1  ;;  %v1070_v34 = vld [vmem:[%s1305_s2 + $0x1c] sm:$0xf]  ;;  %v1072_v38 = vld [vmem:[%s1305_s2 + $0x20] sm:$0xf]  ;;  %p213_p5 = scmp.lt.s32.totalorder %s1216_s16, 5 }
  0x12   : > { %1109 = vmatprep.subr.mxu1 %v1172_v0  ;;  %1102 = vmatmul.mubr.msk.f32.vlgmr.msra.gmra.mxu1 %vm236_vm1, %v221_v2 }
  0x13   : > { %1111 = vmatprep.mubr.msk.f32.mxu1 %vm1173_vm0, %v1172_v0  ;;  %s1311_s16 = smov (!%p213_p5, %s1216_s16), 5 }
  0x14   : > { %387 = vrot.lane.b32.xlu1 %v219_v3, %s1174_s25  ;;  %468 = vrot.lane.b32.xlu0 %v217_v1, %s1176_s5 }
  0x18   : > { %470 = vrot.lane.b32.xlu1 %v219_v3, %s1176_s5  ;;  %231 = vrot.lane.b32.xlu0 %v219_v3, %s1175_s26  ;;  %s1056_s5 = sshll.u32 %s1311_s16, 2 }
  0x1c   : > { %553 = vrot.lane.b32.xlu1 %v219_v3, %s1177_s6  ;;  %551 = vrot.lane.b32.xlu0 %v217_v1, %s1177_s6 }
  0x20   : > { %636 = vrot.lane.b32.xlu1 %v219_v3, %s1178_s7  ;;  %634 = vrot.lane.b32.xlu0 %v217_v1, %s1178_s7 }
  0x24   : > { %719 = vrot.lane.b32.xlu1 %v219_v3, %s1181_s8  ;;  %717 = vrot.lane.b32.xlu0 %v217_v1, %s1181_s8  ;;  %s216_s8 = scalar_lea.vmem %s1307_s4, %s1056_s5 }
  0x28   : > { %802 = vrot.lane.b32.xlu1 %v219_v3, %s1182_s9  ;;  %800 = vrot.lane.b32.xlu0 %v217_v1, %s1182_s9 }
  0x2c   : > { %885 = vrot.lane.b32.xlu1 %v219_v3, %s1183_s10  ;;  %883 = vrot.lane.b32.xlu0 %v217_v1, %s1183_s10 }
  0x30   : > { %972 = vperm.xlu1 %1161, %v964_v6   ;;  %967 = vperm.xlu0 %1160, %v964_v6  }
  0x34   : > { %1162 = vset.pattern.permute.xlu1 %v1184_v7  ;;  %1163 = vset.pattern.permute.xlu0 %v1184_v7 }
  0x35   : > { %978 = vperm.xlu1 %1162, %v964_v6  }
  0x82   : > { %v386_v8 = vpop.permute.xlu1 %385  ;;  %v230_v9 = vpop.permute.xlu0 %229 }
  0x86   : > { %v388_v10 = vpop.permute.xlu1 %387  ;;  %v469_v11 = vpop.permute.xlu0 %468 }
  0x87   : > { %v390_v17 = vsel %vm389_vm4, %v386_v8, %v388_v10 }
  0x8a   : > { %v471_v12 = vpop.permute.xlu1 %470  ;;  %v232_v13 = vpop.permute.xlu0 %231 }
  0x8b   : > { %v473_v15 = vsel %vm472_vm2, %v469_v11, %v471_v12  ;;  %v234_v16 = vsel %vm233_vm3, %v230_v9, %v232_v13 }
  0x8c   : > { %1095 = vmatpush3.msra.mxu0 %v234_v16  ;;  %1110 = vmatpush3.msra.mxu1 %v473_v15 }
  0x8d   : > { %1097 = vmatmul.mubr.msk.f32.vlgmr.msra.gmra.mxu0 %vm236_vm1, %v1057_v14  ;;  %1104 = vmatprep.subr.mxu0 %v1172_v0 }
  0x8e   : > { %v554_v19 = vpop.permute.xlu1 %553  ;;  %1105 = vmatpush3.msra.mxu0 %v390_v17  ;;  %v552_v20 = vpop.permute.xlu0 %551  ;;  %1106 = vmatprep.mubr.msk.f32.mxu0 %vm1173_vm0, %v1172_v0 }
  0x8f   : > { %v556_v22 = vsel %vm555_vm5, %v552_v20, %v554_v19  ;;  %1114 = vmatprep.subr.mxu0 %v1172_v0  ;;  %1119 = vmatprep.subr.mxu1 %v1172_v0 }
  0x90   : > { %1112 = vmatmul.mubr.msk.f32.vlgmr.msra.gmra.mxu1 %vm236_vm1, %v1062_v18 }
  0x91   : > { %1107 = vmatmul.mubr.msk.f32.vlgmr.msra.gmra.mxu0 %vm236_vm1, %v1060_v21  ;;  %1121 = vmatprep.mubr.msk.f32.mxu1 %vm1173_vm0, %v1172_v0 }
  0x92   : > { %1115 = vmatpush3.msra.mxu0 %v556_v22  ;;  %v637_v23 = vpop.permute.xlu1 %636  ;;  %v635_v24 = vpop.permute.xlu0 %634  ;;  %1116 = vmatprep.mubr.msk.f32.mxu0 %vm1173_vm0, %v1172_v0 }
  0x93   : > { %v639_v27 = vsel %vm638_vm6, %v635_v24, %v637_v23  ;;  %1124 = vmatprep.subr.mxu0 %v1172_v0 }
  0x94   : > { %1120 = vmatpush3.msra.mxu1 %v639_v27 }
  0x95   : > { %1117 = vmatmul.mubr.msk.f32.vlgmr.msra.gmra.mxu0 %vm236_vm1, %v1064_v25  ;;  %1122 = vmatmul.mubr.msk.f32.vlgmr.msra.gmra.mxu1 %vm236_vm1, %v1066_v26 }
  0x96   : > { %v720_v28 = vpop.permute.xlu1 %719  ;;  %v718_v29 = vpop.permute.xlu0 %717  ;;  %1129 = vmatprep.subr.mxu1 %v1172_v0  ;;  %1126 = vmatprep.mubr.msk.f32.mxu0 %vm1173_vm0, %v1172_v0 }
  0x97   : > { %v722_v31 = vsel %vm721_vm7, %v718_v29, %v720_v28  ;;  %1131 = vmatprep.mubr.msk.f32.mxu1 %vm1173_vm0, %v1172_v0 }
  0x98   : > { %1125 = vmatpush3.msra.mxu0 %v722_v31 }
  0x99   : > { %1127 = vmatmul.mubr.msk.f32.vlgmr.msra.gmra.mxu0 %vm236_vm1, %v1068_v30  ;;  %1134 = vmatprep.subr.mxu0 %v1172_v0 }
  0x9a   : > { %v803_v32 = vpop.permute.xlu1 %802  ;;  %v801_v33 = vpop.permute.xlu0 %800  ;;  %1136 = vmatprep.mubr.msk.f32.mxu0 %vm1173_vm0, %v1172_v0 }
  0x9b   : > { %v805_v35 = vsel %vm804_vm8, %v801_v33, %v803_v32 }
  0x9c   : > { %1130 = vmatpush3.msra.mxu1 %v805_v35 }
  0x9d   : > { %1132 = vmatmul.mubr.msk.f32.vlgmr.msra.gmra.mxu1 %vm236_vm1, %v1070_v34 }
  0x9e   : > { %v886_v36 = vpop.permute.xlu1 %885  ;;  %v884_v37 = vpop.permute.xlu0 %883 }
  0x9f   : > { %v888_v39 = vsel %vm887_vm9, %v884_v37, %v886_v36 }
  0xa0   : > { %1135 = vmatpush3.msra.mxu0 %v888_v39 }
  0xa1   : > { %1137 = vmatmul.mubr.msk.f32.vlgmr.msra.gmra.mxu0 %vm236_vm1, %v1072_v38 }
  0xab   : > { %v973_v62 = vpop.permute.xlu1 %972  ;;  %v968_v1 = vpop.permute.xlu0 %967 }
  0xb0   : > { %v979_v5 = vpop.permute.xlu1 %978 }
  0xd2   : > { %v379_v40 = vpop.f32.mrf.mxu1 }
  0xd4   : > { %v1103_v41 = vpop.f32.mrf.mxu1 }
 0x14d   : > { %v306_v42 = vpop.f32.mrf.mxu0 }
 0x14e   : > { %v380_v43 = vadd.f32 %v379_v40, %v306_v42 }
 0x14f   : > { %v1098_v44 = vpop.f32.mrf.mxu0 }
 0x150   : > { %v544_v45 = vpop.f32.mrf.mxu1 }
 0x151   : > { %v461_v46 = vpop.f32.mrf.mxu0 }
 0x152   : > { %v465_v47 = vadd.f32 %v461_v46, %v380_v43  ;;  %v1113_v48 = vpop.f32.mrf.mxu1 }
 0x153   : > { %v1108_v49 = vpop.f32.mrf.mxu0 }
 0x154   : > { %v548_v50 = vadd.f32 %v544_v45, %v465_v47 }
 0x155   : > { %v627_v51 = vpop.f32.mrf.mxu0  ;;  %v710_v52 = vpop.f32.mrf.mxu1 }
 0x156   : > { %v631_v53 = vadd.f32 %v627_v51, %v548_v50 }
 0x157   : > { %v1118_v54 = vpop.f32.mrf.mxu0  ;;  %v1123_v55 = vpop.f32.mrf.mxu1 }
 0x158   : > { %v714_v56 = vadd.f32 %v710_v52, %v631_v53 }
 0x159   : > { %v793_v57 = vpop.f32.mrf.mxu0 }
 0x15a   : > { %v797_v59 = vadd.f32 %v793_v57, %v714_v56 }
 0x15b   : > { %v1128_v58 = vpop.f32.mrf.mxu0 }
 0x15d   : > { %v876_v60 = vpop.f32.mrf.mxu1 }
 0x15e   : > { %v880_v63 = vadd.f32 %v876_v60, %v797_v59 }
 0x15f   : > { %v1133_v61 = vpop.f32.mrf.mxu1 }
 0x161   : > { %v959_v0 = vpop.f32.mrf.mxu0 }
 0x162   : > { %v963_v2 = vadd.f32 %v959_v0, %v880_v63 }
 0x163   : > { %v1138_v3 = vpop.f32.mrf.mxu0 }
 0x164   : > { %v970_v4 = vmul.f32 %v968_v1, %v963_v2 }
 0x166   : > { %v975_v6 = vadd.f32 %v973_v62, %v970_v4 }
 0x168   : > { %vm976_vm10 = vcmp.gt.f32.partialorder %v975_v6, 0.0  ;;  %v981_v7 = vmul.f32 %v979_v5, %v975_v6 }
 0x16a   : > { %v982_v8 = vsel %vm976_vm10, %v975_v6, %v981_v7 }
 0x16b   : > { %983 = vst [vmem:[%s216_s8] sm:$0xf] %v982_v8 }
 0x16c PF: > { %s14_s15 = sadd.s32 1, %s1170_s15  }
 0x16d   : > { %p11_p6 = scmp.ge.s32.totalorder %s14_s15, 8  }
 0x16f   :  { %13 = sbr.rel (!%p11_p6) target bundleno = 1 (0x1), region = 77 }

// kernel: complex_conv_block.2
= control target key start
LH: loop header
LB: loop body
LE: loop exit
PB: predicated region body
PF: predicated region fallthrough
CT: control target
= control target key end

     0   :  { %s1205_s12 = smov 0   ;;  %s1297_s0 = inlined_call_operand.vmem [shape: f32[8,896], index: 0, kind: input, shape index: {}, may-alias: {0,1}]   ;;  %s1298_s1 = inlined_call_operand.vmem [shape: f32[8,896], index: 1, kind: input, shape index: {}, may-alias: {0,1}]   ;;  %s1299_s2 = inlined_call_operand.vmem [shape: f32[9,4,8], index: 2, kind: input, shape index: {}]   ;;  %s1300_s3 = inlined_call_operand.vmem [shape: f32[6,4,2], index: 3, kind: output, shape index: {}]  }
   0x1 LB: > { %s1211_s13 = sadd.s32 4294967295, %s1173_s12   ;;  %p1055_p0 = scmp.ge.s32.totalorder %s1173_s12, 1  ;;  %s1173_s12 = sphi %s1205_s12, %s13_s12  }
   0x2   : > { %p149_p1 = scmp.lt.s32.totalorder %s1173_s12, 7 }
   0x4   : > { %p150_p2 = pnand %p1055_p0, %p149_p1 }
   0x5   : > { %p176_p3 = scmp.lt.s32.totalorder (!%p150_p2), %s1211_s13, 6  ;;  %s180_s14 = sadd.s32 (!%p150_p2), 1, %s1211_s13 }
   0x6   : > { %153 = sbr.rel (%p150_p2) target bundleno = 501 (0x1f5), region = 32  ;;  %p181_p4 = scmp.lt.s32.totalorder (!%p150_p2), %s180_s14, 6 }
   0x7   : > { %s1177_s22 = smov (!%p150_p2), 126   ;;  %s1178_s23 = smov (!%p150_p2), 127  }
   0x8   : > { %s1179_s28 = smov (!%p150_p2), 110   ;;  %s1180_s29 = smov (!%p150_p2), 109  }
   0x9   : > { %s1181_s30 = smov (!%p150_p2), 108   ;;  %s1182_s4 = smov (!%p150_p2), 92  }
   0xa   : > { %s1183_s5 = smov (!%p150_p2), 91   ;;  %s1184_s6 = smov (!%p150_p2), 90  }
   0xb   : > { %v1175_v0 = vmov 0.0   ;;  %s177_s15 = scalar_select %p176_p3, %s1211_s13, 6  ;;  %vm1176_vm0 = vmmov 0   ;;  %v194_v2 = vld [vmem:[%s1299_s2] sm:$0xf]  ;;  %vm209_vm1 = vcmask 64512   ;;  %v938_v38 = vlaneseq }
   0xc   : > { %1105 = vmatprep.subr.mxu1 %v1175_v0  ;;  %1100 = vmatprep.subr.mxu0 %v1175_v0  ;;  %s1302_s14 = smov (!%p181_p4, %s180_s14), 6  ;;  %vm445_vm2 = vcmask 900096   ;;  %vm206_vm3 = vcmask 1039360   ;;  %vm362_vm4 = vcmask 1031168   ;;  %v1059_v10 = vld [vmem:[%s1299_s2 + $0x4] sm:$0xf] }
   0xd   : > { %1107 = vmatprep.mubr.msk.f32.mxu1 %vm1176_vm0, %v1175_v0  ;;  %1102 = vmatprep.mubr.msk.f32.mxu0 %vm1176_vm0, %v1175_v0  ;;  %s1056_s16 = sshll.u32 %s177_s15, 3  ;;  %s1057_s24 = sshll.u32 %s1302_s14, 3  ;;  %vm528_vm5 = vcmask 891904   ;;  %v1064_v14 = vld [vmem:[%s1299_s2 + $0xc] sm:$0xf]  ;;  %vm611_vm6 = vcmask 883712  }
   0xe   : > { %s179_s19 = scalar_lea.vmem %s1297_s0, %s1056_s16  ;;  %s184_s27 = scalar_lea.vmem %s1298_s1, %s1057_s24  ;;  %v1062_v17 = vld [vmem:[%s1299_s2 + $0x8] sm:$0xf]  ;;  %v1066_v21 = vld [vmem:[%s1299_s2 + $0x10] sm:$0xf]  ;;  %v1068_v22 = vld [vmem:[%s1299_s2 + $0x14] sm:$0xf] }
   0xf   : > { %v190_v1 = vld [vmem:[%s179_s19] sm:$0xff]  ;;  %vm694_vm7 = vcmask 752640   ;;  %v1070_v26 = vld [vmem:[%s1299_s2 + $0x18] sm:$0xf]  ;;  %vm777_vm8 = vcmask 744448   ;;  %vm860_vm9 = vcmask 736256  }
  0x10   : > { %358 = vrot.lane.b32.xlu1 %v190_v1, %s1177_s22  ;;  %202 = vrot.lane.b32.xlu0 %v190_v1, %s1178_s23  ;;  %v192_v3 = vld [vmem:[%s184_s27] sm:$0xff]  ;;  %v1072_v30 = vld [vmem:[%s1299_s2 + $0x1c] sm:$0xf]  ;;  %s1076_s25 = sshll.u32 %s1211_s13, 7  ;;  %v939_v39 = vand.u32 127, %v938_v38  ;;  %p186_p5 = scmp.lt.s32.totalorder %s1211_s13, 5 }
  0x11   : > { %1106 = vmatpush3.msra.mxu1 %v190_v1  ;;  %v1074_v34 = vld [vmem:[%s1299_s2 + $0x20] sm:$0xf]  ;;  %v940_v40 = vstv %s1076_s25 }
  0x12   : > { %1115 = vmatprep.subr.mxu1 %v1175_v0  ;;  %1108 = vmatmul.mubr.msk.f32.vlgmr.msra.gmra.mxu1 %vm209_vm1, %v194_v2  ;;  %v941_v41 = vadd.s32 %v940_v40, %v939_v39  ;;  %s1304_s13 = smov (!%p186_p5, %s1211_s13), 5 }
  0x13   : > { %1117 = vmatprep.mubr.msk.f32.mxu1 %vm1176_vm0, %v1175_v0  ;;  %s1058_s26 = sshll.u32 %s1304_s13, 2 }
  0x14   : > { %360 = vrot.lane.b32.xlu1 %v192_v3, %s1177_s22  ;;  %441 = vrot.lane.b32.xlu0 %v190_v1, %s1179_s28  ;;  %v942_v42 = vcvt.s32.f32 %v941_v41  ;;  %vm966_vm14 = vcmp.lt.s32.totalorder %v941_v41, 648 }
  0x16   : > { %v943_v43 = vmul.f32 0.0030864198, %v942_v42 }
  0x18   : > { %443 = vrot.lane.b32.xlu1 %v192_v3, %s1179_s28  ;;  %204 = vrot.lane.b32.xlu0 %v192_v3, %s1178_s23  ;;  %v944_v44 = vfloor.f32 %v943_v43 }
  0x1a   : > { %v1145_v45 = vtrunc.f32 %v944_v44 }
  0x1c   : > { %526 = vrot.lane.b32.xlu1 %v192_v3, %s1180_s29  ;;  %524 = vrot.lane.b32.xlu0 %v190_v1, %s1180_s29  ;;  %v1146_v46 = vcvt.f32.s32 %v1145_v45  ;;  %s189_s29 = scalar_lea.vmem %s1300_s3, %s1058_s26 }
  0x1e   : > { %v946_v47 = vmul.u32 324, %v1146_v46 }
  0x20   : > { %609 = vrot.lane.b32.xlu1 %v192_v3, %s1181_s30  ;;  %607 = vrot.lane.b32.xlu0 %v190_v1, %s1181_s30  ;;  %v947_v48 = vsub.s32 %v941_v41, %v946_v47 }
  0x22   : > { %v949_v49 = vadd.s32 324, %v947_v48  ;;  %vm948_vm10 = vcmp.lt.s32.totalorder %v947_v48, 0 }
  0x24   : > { %692 = vrot.lane.b32.xlu1 %v192_v3, %s1182_s4  ;;  %690 = vrot.lane.b32.xlu0 %v190_v1, %s1182_s4  ;;  %v950_v50 = vsel %vm948_vm10, %v949_v49, %v947_v48 }
  0x25   : > { %v1077_v51 = vadd.s32 4294966972, %v950_v50  ;;  %vm951_vm11 = vcmp.ge.s32.totalorder %v950_v50, 324 }
  0x27   : > { %v953_v52 = vsel %vm951_vm11, %v1077_v51, %v950_v50 }
  0x28   : > { %775 = vrot.lane.b32.xlu1 %v192_v3, %s1183_s5  ;;  %773 = vrot.lane.b32.xlu0 %v190_v1, %s1183_s5  ;;  %v954_v53 = vcvt.s32.f32 %v953_v52  ;;  %vm967_vm15 = vcmp.lt.s32.totalorder %v953_v52, 288 }
  0x2a   : > { %v955_v54 = vmul.f32 0.055555556, %v954_v53 }
  0x2c   : > { %858 = vrot.lane.b32.xlu1 %v192_v3, %s1184_s6  ;;  %856 = vrot.lane.b32.xlu0 %v190_v1, %s1184_s6  ;;  %v956_v55 = vfloor.f32 %v955_v54 }
  0x2e   : > { %v1147_v56 = vtrunc.f32 %v956_v55 }
  0x30   : > { %v1148_v57 = vcvt.f32.s32 %v1147_v56 }
  0x32   : > { %v958_v58 = vmul.u32 18, %v1148_v57 }
  0x34   : > { %v959_v59 = vsub.s32 %v953_v52, %v958_v58 }
  0x36   : > { %v961_v61 = vadd.s32 18, %v959_v59  ;;  %vm960_vm12 = vcmp.lt.s32.totalorder %v959_v59, 0 }
  0x38   : > { %v962_v3 = vsel %vm960_vm12, %v961_v61, %v959_v59 }
  0x39   : > { %vm963_vm13 = vcmp.ge.s32.totalorder %v962_v3, 18 }
  0x82   : > { %v359_v4 = vpop.permute.xlu1 %358  ;;  %v203_v5 = vpop.permute.xlu0 %202 }
  0x86   : > { %v361_v6 = vpop.permute.xlu1 %360  ;;  %v442_v7 = vpop.permute.xlu0 %441 }
  0x87   : > { %v363_v13 = vsel %vm362_vm4, %v359_v4, %v361_v6  ;;  %vm982_vm4 = vcmask 7168  }
  0x8a   : > { %v444_v8 = vpop.permute.xlu1 %443  ;;  %v205_v9 = vpop.permute.xlu0 %204 }
  0x8b   : > { %v446_v11 = vsel %vm445_vm2, %v442_v7, %v444_v8  ;;  %v207_v12 = vsel %vm206_vm3, %v203_v5, %v205_v9  ;;  %v1078_v8 = vadd.s32 4294967278, %v962_v3  ;;  %vm974_vm3 = vcmask 1043456  }
  0x8c   : > { %1101 = vmatpush3.msra.mxu0 %v207_v12  ;;  %1116 = vmatpush3.msra.mxu1 %v446_v11 }
  0x8d   : > { %1103 = vmatmul.mubr.msk.f32.vlgmr.msra.gmra.mxu0 %vm209_vm1, %v1059_v10  ;;  %1110 = vmatprep.subr.mxu0 %v1175_v0 }
  0x8e   : > { %v527_v15 = vpop.permute.xlu1 %526  ;;  %1111 = vmatpush3.msra.mxu0 %v363_v13  ;;  %v525_v16 = vpop.permute.xlu0 %524  ;;  %1112 = vmatprep.mubr.msk.f32.mxu0 %vm1176_vm0, %v1175_v0 }
  0x8f   : > { %v529_v18 = vsel %vm528_vm5, %v525_v16, %v527_v15  ;;  %1120 = vmatprep.subr.mxu0 %v1175_v0  ;;  %1125 = vmatprep.subr.mxu1 %v1175_v0  ;;  %v965_v15 = vsel %vm963_vm13, %v1078_v8, %v962_v3  ;;  %vm984_vm5 = vcmask 11264  }
  0x90   : > { %1118 = vmatmul.mubr.msk.f32.vlgmr.msra.gmra.mxu1 %vm209_vm1, %v1064_v14 }
  0x91   : > { %1113 = vmatmul.mubr.msk.f32.vlgmr.msra.gmra.mxu0 %vm209_vm1, %v1062_v17  ;;  %1127 = vmatprep.mubr.msk.f32.mxu1 %vm1176_vm0, %v1175_v0 }
  0x92   : > { %1121 = vmatpush3.msra.mxu0 %v529_v18  ;;  %v610_v19 = vpop.permute.xlu1 %609  ;;  %v608_v20 = vpop.permute.xlu0 %607  ;;  %1122 = vmatprep.mubr.msk.f32.mxu0 %vm1176_vm0, %v1175_v0 }
  0x93   : > { %v612_v23 = vsel %vm611_vm6, %v608_v20, %v610_v19  ;;  %1130 = vmatprep.subr.mxu0 %v1175_v0 }
  0x94   : > { %1126 = vmatpush3.msra.mxu1 %v612_v23 }
  0x95   : > { %1123 = vmatmul.mubr.msk.f32.vlgmr.msra.gmra.mxu0 %vm209_vm1, %v1066_v21  ;;  %1128 = vmatmul.mubr.msk.f32.vlgmr.msra.gmra.mxu1 %vm209_vm1, %v1068_v22 }
  0x96   : > { %v693_v24 = vpop.permute.xlu1 %692  ;;  %v691_v25 = vpop.permute.xlu0 %690  ;;  %1135 = vmatprep.subr.mxu1 %v1175_v0  ;;  %1132 = vmatprep.mubr.msk.f32.mxu0 %vm1176_vm0, %v1175_v0 }
  0x97   : > { %v695_v27 = vsel %vm694_vm7, %v691_v25, %v693_v24  ;;  %1137 = vmatprep.mubr.msk.f32.mxu1 %vm1176_vm0, %v1175_v0 }
  0x98   : > { %1131 = vmatpush3.msra.mxu0 %v695_v27 }
  0x99   : > { %1133 = vmatmul.mubr.msk.f32.vlgmr.msra.gmra.mxu0 %vm209_vm1, %v1070_v26  ;;  %1140 = vmatprep.subr.mxu0 %v1175_v0 }
  0x9a   : > { %v776_v28 = vpop.permute.xlu1 %775  ;;  %v774_v29 = vpop.permute.xlu0 %773  ;;  %1142 = vmatprep.mubr.msk.f32.mxu0 %vm1176_vm0, %v1175_v0  ;;  %vm968_vm0 = vmand %vm966_vm14, %vm967_vm15 }
  0x9b   : > { %v778_v31 = vsel %vm777_vm8, %v774_v29, %v776_v28 }
  0x9c   : > { %1136 = vmatpush3.msra.mxu1 %v778_v31 }
  0x9d   : > { %1138 = vmatmul.mubr.msk.f32.vlgmr.msra.gmra.mxu1 %vm209_vm1, %v1072_v30 }
  0x9e   : > { %v859_v32 = vpop.permute.xlu1 %858  ;;  %v857_v33 = vpop.permute.xlu0 %856 }
  0x9f   : > { %v861_v35 = vsel %vm860_vm9, %v857_v33, %v859_v32 }
  0xa0   : > { %1141 = vmatpush3.msra.mxu0 %v861_v35 }
  0xa1   : > { %1143 = vmatmul.mubr.msk.f32.vlgmr.msra.gmra.mxu0 %vm209_vm1, %v1074_v34  ;;  %vm969_vm1 = vcmp.lt.s32.totalorder %v965_v15, 16 }
  0xa2   : > { %vm970_vm2 = vmand %vm968_vm0, %vm969_vm1 }
  0xa3   : > { %v1079_v23 = vsel %vm970_vm2, 1.0, %v1175_v0 }
  0xd2   : > { %v352_v36 = vpop.f32.mrf.mxu1 }
  0xd4   : > { %v1109_v37 = vpop.f32.mrf.mxu1 }
 0x14d   : > { %v279_v60 = vpop.f32.mrf.mxu0 }
 0x14e   : > { %v353_v62 = vadd.f32 %v352_v36, %v279_v60 }
 0x14f   : > { %v1104_v63 = vpop.f32.mrf.mxu0 }
 0x150   : > { %v517_v1 = vpop.f32.mrf.mxu1 }
 0x151   : > { %v434_v2 = vpop.f32.mrf.mxu0 }
 0x152   : > { %v438_v4 = vadd.f32 %v434_v2, %v353_v62  ;;  %v1119_v5 = vpop.f32.mrf.mxu1 }
 0x153   : > { %v1114_v6 = vpop.f32.mrf.mxu0 }
 0x154   : > { %v521_v7 = vadd.f32 %v517_v1, %v438_v4 }
 0x155   : > { %v600_v9 = vpop.f32.mrf.mxu0  ;;  %v683_v10 = vpop.f32.mrf.mxu1 }
 0x156   : > { %v604_v11 = vadd.f32 %v600_v9, %v521_v7 }
 0x157   : > { %v1124_v12 = vpop.f32.mrf.mxu0  ;;  %v1129_v13 = vpop.f32.mrf.mxu1 }
 0x158   : > { %v687_v14 = vadd.f32 %v683_v10, %v604_v11 }
 0x159   : > { %v766_v16 = vpop.f32.mrf.mxu0 }
 0x15a   : > { %v770_v18 = vadd.f32 %v766_v16, %v687_v14 }
 0x15b   : > { %v1134_v17 = vpop.f32.mrf.mxu0 }
 0x15d   : > { %v849_v19 = vpop.f32.mrf.mxu1 }
 0x15e   : > { %v853_v21 = vadd.f32 %v849_v19, %v770_v18 }
 0x15f   : > { %v1139_v20 = vpop.f32.mrf.mxu1 }
 0x161   : > { %v932_v22 = vpop.f32.mrf.mxu0 }
 0x162   : > { %v936_v24 = vadd.f32 %v932_v22, %v853_v21 }
 0x163   : > { %v1144_v25 = vpop.f32.mrf.mxu0 }
 0x164   : > { %v973_v26 = vmul.f32 %v1079_v23, %v936_v24 }
 0x166   : > { %v975_v27 = vsel %vm974_vm3, %v973_v26, 0.0  ;;  %v978_v28 = vmul.f32 %v973_v26, %v936_v24 }
 0x167   : > { %976 = vadd.xlane.f32.xlu0 %v975_v27 }
 0x168   : > { %v979_v29 = vsel %vm974_vm3, %v978_v28, 0.0 }
 0x169   : > { %980 = vadd.xlane.f32.xlu1 %v979_v29 }
 0x1f0   : > { %v977_v30 = vpop.xlane.xlu0 %976 }
 0x1f2   : > { %v981_v0 = vpop.xlane.xlu1 %980 }
 0x1f3   : > { %v983_v31 = vsel %vm982_vm4, %v977_v30, %v981_v0 }
 0x1f4   : > { %985 = vst.msk [vmem:[%s189_s29] sm:$0xf] %vm984_vm5, %v983_v31 }
 0x1f5 PF: > { %s13_s12 = sadd.s32 1, %s1173_s12  }
 0x1f6   : > { %p10_p6 = scmp.ge.s32.totalorder %s13_s12, 8  }
 0x1f8   :  { %12 = sbr.rel (!%p10_p6) target bundleno = 1 (0x1), region = 73 }

</bundles_post_ra>
